<compile_context>
chip_gen: v6e
topology: v6e:2x2x1
jax: 0.10.0
libtpu: 0.0.40
codegen_flags: <defaults>
</compile_context>

<pallas_src>
import functools

import jax
import jax.numpy as jnp
from jax.experimental import pallas as pl
from jax.experimental.pallas import tpu as pltpu


def _round_up(n, m):
    return ((n + m - 1) // m) * m


def gnet_kernel(tx_ref, w1_ref, b_ref, w23_ref, wl_ref, bl_ref, o_ref, *, hh, inv_TT):
    tx = tx_ref[...]                     # (dim+1, TB)   row 0 = t, rows 1.. = x (raw)
    t = tx[0:1, :]                       # (1,   TB)
    x = tx[1:, :]                        # (dim, TB)

    # lin1 (input normalization folded into w1'/b1' in gnet_prepare): h = W1' @ [t; x] + b1'
    h = jnp.tanh(jnp.dot(w1_ref[...], tx, preferred_element_type=jnp.float32)
                 + b_ref[:, 0:1])

    # residual tanh blocks 2 / 3 (w2, w3 packed as one (2, ns, ns) operand)
    h = jnp.tanh(h + hh * (jnp.dot(w23_ref[0], h, preferred_element_type=jnp.float32)
                           + b_ref[:, 1:2]))
    h = jnp.tanh(h + hh * (jnp.dot(w23_ref[1], h, preferred_element_type=jnp.float32)
                           + b_ref[:, 2:3]))

    # linlast
    out = jnp.dot(wl_ref[...], h, preferred_element_type=jnp.float32) + bl_ref[...]

    # convex interpolation over time: c1*out + (1-c1)*x == x + c1*(out - x)
    o_ref[...] = x + (t * inv_TT) * (out - x)


def gnet_prepare(params):
    """One-time parameter preparation (hoist out of the per-call forward path).

    `params` uses PyTorch Linear convention: w* are (out_features, in_features),
    b* are (out_features,), mu/std are (1, dim).
    """
    dim, ns = params["wl"].shape
    inv_std = 1.0 / params["std"]                                   # (1, dim)
    w1 = params["w1"]                                               # (ns, dim+1)
    w1x = w1[:, 1:] * inv_std                                       # (ns, dim)  norm folded
    w1p = jnp.concatenate([w1[:, :1], w1x], axis=1)                 # (ns, dim+1)
    b1p = params["b1"].reshape(ns, 1) - w1x @ params["mu"].T        # (ns, 1)
    b123 = jnp.concatenate([b1p,
                            params["b2"].reshape(ns, 1),
                            params["b3"].reshape(ns, 1)], axis=1)   # (ns, 3)
    w23 = jnp.stack([params["w2"], params["w3"]], axis=0)           # (2, ns, ns)
    return {"w1": w1p, "b123": b123, "w23": w23,
            "wl": params["wl"], "bl": params["bl"].reshape(dim, 1)}


def gnet_forward(t, x, prepped, *, hh, TT, tile_b=32768):
    """t: (B, 1), x: (B, dim); prepped = gnet_prepare(params). Returns (B, dim)."""
    B, dim = x.shape
    ns = prepped["w23"].shape[-1]

    # Batch tile lives on the 128-lane axis.  Cap it so that (a) the grid has >= 2 steps
    # whenever the batch allows it (v7x megacore) and (b) the (ns, tile_b) f32
    # intermediates stay far below the 32 MiB scoped-VMEM default on every chip.
    half_b = _round_up((B + 1) // 2, 128)
    tile_b = _round_up(max(128, min(tile_b, half_b)), 128)
    Bp = _round_up(B, tile_b)

    # Single fused rewrite: fuse t into x, transpose to lane-dense layout, pad the batch.
    tx = jnp.concatenate([t, x], axis=1).T                          # (dim+1, B)
    if Bp != B:
        tx = jnp.pad(tx, ((0, 0), (0, Bp - B)))

    kernel = functools.partial(gnet_kernel, hh=float(hh), inv_TT=1.0 / float(TT))
    out = pl.pallas_call(
        kernel,
        out_shape=jax.ShapeDtypeStruct((dim, Bp), jnp.float32),
        grid_spec=pltpu.PrefetchScalarGridSpec(
            num_scalar_prefetch=0,
            grid=(Bp // tile_b,),
            in_specs=[
                pl.BlockSpec((dim + 1, tile_b), lambda i: (0, i)),   # [t; x], batch tiled
                pl.BlockSpec((ns, dim + 1), lambda i: (0, 0)),       # w1' (norm folded)
                pl.BlockSpec((ns, 3), lambda i: (0, 0)),             # b1'/b2/b3
                pl.BlockSpec((2, ns, ns), lambda i: (0, 0, 0)),      # w2 / w3
                pl.BlockSpec((dim, ns), lambda i: (0, 0)),           # wl
                pl.BlockSpec((dim, 1), lambda i: (0, 0)),            # bl
            ],
            out_specs=pl.BlockSpec((dim, tile_b), lambda i: (0, i)),
        ),
        compiler_params=pltpu.CompilerParams(
            dimension_semantics=("parallel",),
            # Cap (not an allocation); actual use <= ~24 MiB at tile_b=32768,
            # comfortably inside v7x's 64 MiB per-TC VMEM and v5e/v6e's 128 MiB.
            vmem_limit_bytes=64 * 1024 * 1024),
    )(tx, prepped["w1"], prepped["b123"], prepped["w23"], prepped["wl"], prepped["bl"])

    return out[:, :B].T


def gnet_reference(t, x, params, *, hh, TT):
    """Pure-JAX reference mirroring the PyTorch forward (un-folded, row-major)."""
    xn = (x - params["mu"]) / params["std"]
    h = jnp.concatenate([t, xn], axis=1)
    h = jnp.tanh(h @ params["w1"].T + params["b1"])
    h = jnp.tanh(h + hh * (h @ params["w2"].T + params["b2"]))
    h = jnp.tanh(h + hh * (h @ params["w3"].T + params["b3"]))
    out = h @ params["wl"].T + params["bl"]
    c1 = t / TT
    c2 = (TT - t) / TT
    return c1 * out + c2 * x


def init_params(key, dim, ns):
    ks = jax.random.split(key, 8)
    scale = 0.1
    return {
        "mu": jnp.full((1, dim), 0.5, jnp.float32),
        "std": jnp.full((1, dim), 2.0, jnp.float32),
        "w1": scale * jax.random.normal(ks[0], (ns, dim + 1), jnp.float32),
        "b1": scale * jax.random.normal(ks[1], (ns,), jnp.float32),
        "w2": scale * jax.random.normal(ks[2], (ns, ns), jnp.float32),
        "b2": scale * jax.random.normal(ks[3], (ns,), jnp.float32),
        "w3": scale * jax.random.normal(ks[4], (ns, ns), jnp.float32),
        "b3": scale * jax.random.normal(ks[5], (ns,), jnp.float32),
        "wl": scale * jax.random.normal(ks[6], (dim, ns), jnp.float32),
        "bl": scale * jax.random.normal(ks[7], (dim,), jnp.float32),
    }


if __name__ == "__main__":
    dim, ns = 4, 32
    hh, TT = 0.5, 1.0

    key = jax.random.PRNGKey(0)
    k_t, k_x, k_p = jax.random.split(key, 3)
    params = init_params(k_p, dim, ns)
    prepped = gnet_prepare(params)          # hoisted one-time parameter prep

    fwd = jax.jit(functools.partial(gnet_forward, hh=hh, TT=TT))
    fwd_small_tile = jax.jit(functools.partial(gnet_forward, hh=hh, TT=TT, tile_b=128))

    # case 1: small batch (single 128-lane tile)
    B = 8
    t = jax.random.uniform(k_t, (B, 1), jnp.float32) * TT
    x = jax.random.normal(k_x, (B, dim), jnp.float32)
    out = jax.block_until_ready(fwd(t, x, prepped))
    ref = gnet_reference(t, x, params, hh=hh, TT=TT)
    assert out.shape == (B, dim)
    assert jnp.allclose(out, ref, atol=1e-5, rtol=1e-5), "mismatch vs reference (B=8)"

    # case 2: unaligned batch exercising the (fused) padding path
    B = 13
    t2 = jax.random.uniform(k_t, (B, 1), jnp.float32) * TT
    x2 = jax.random.normal(k_x, (B, dim), jnp.float32)
    out2 = jax.block_until_ready(fwd(t2, x2, prepped))
    ref2 = gnet_reference(t2, x2, params, hh=hh, TT=TT)
    assert out2.shape == (B, dim)
    assert jnp.allclose(out2, ref2, atol=1e-5, rtol=1e-5), "mismatch vs reference (B=13)"

    # case 3: multi-step batch grid (3 grid steps at tile_b=128) with padding
    B = 300
    t3 = jax.random.uniform(k_t, (B, 1), jnp.float32) * TT
    x3 = jax.random.normal(k_x, (B, dim), jnp.float32)
    out3 = jax.block_until_ready(fwd_small_tile(t3, x3, prepped))
    ref3 = gnet_reference(t3, x3, params, hh=hh, TT=TT)
    assert out3.shape == (B, dim)
    assert jnp.allclose(out3, ref3, atol=1e-5, rtol=1e-5), "mismatch vs reference (B=300)"

    # TODO(synk): grad_t (autograd time derivative dG/dt) is not part of the forward hot
    # path; implement it with jax.jvp / jax.jacfwd over gnet_forward, not inside the kernel.
    print("KERNEL_OK")
</pallas_src>

<mosaic_0001>
module attributes {stable_mosaic.version = 11 : i64} {
  func.func @gnet_kernel(%arg0: i32, %arg1: memref<5x128xf32, #tpu.memory_space<vmem>>, %arg2: memref<32x5xf32, #tpu.memory_space<vmem>>, %arg3: memref<32x3xf32, #tpu.memory_space<vmem>>, %arg4: memref<2x32x32xf32, #tpu.memory_space<vmem>>, %arg5: memref<4x32xf32, #tpu.memory_space<vmem>>, %arg6: memref<4x1xf32, #tpu.memory_space<vmem>>, %arg7: memref<4x128xf32, #tpu.memory_space<vmem>>) attributes {dimension_semantics = [#tpu.dimension_semantics<parallel>], iteration_bounds = array<i64: 1>, scalar_prefetch = 0 : i64, scratch_operands = 0 : i64, tpu.core_type = #tpu.core_type<tc>, window_params = [{transform_indices = @transform_0, window_bounds = array<i64: 5, 128>}, {pipeline_mode = #tpu.pipeline_mode<synchronous>, transform_indices = @transform_1, window_bounds = array<i64: 32, 5>}, {pipeline_mode = #tpu.pipeline_mode<synchronous>, transform_indices = @transform_2, window_bounds = array<i64: 32, 3>}, {pipeline_mode = #tpu.pipeline_mode<synchronous>, transform_indices = @transform_3, window_bounds = array<i64: 2, 32, 32>}, {pipeline_mode = #tpu.pipeline_mode<synchronous>, transform_indices = @transform_4, window_bounds = array<i64: 4, 32>}, {pipeline_mode = #tpu.pipeline_mode<synchronous>, transform_indices = @transform_5, window_bounds = array<i64: 4, 1>}, {transform_indices = @transform_6, window_bounds = array<i64: 4, 128>}]} {
    %c0 = arith.constant 0 : index
    %c0_0 = arith.constant 0 : index
    %0 = vector.load %arg1[%c0, %c0_0] : memref<5x128xf32, #tpu.memory_space<vmem>>, vector<5x128xf32>
    %1 = vector.extract_strided_slice %0 {offsets = [0, 0], sizes = [1, 128], strides = [1, 1]} : vector<5x128xf32> to vector<1x128xf32>
    %2 = vector.extract_strided_slice %0 {offsets = [1, 0], sizes = [4, 128], strides = [1, 1]} : vector<5x128xf32> to vector<4x128xf32>
    %c0_1 = arith.constant 0 : index
    %c0_2 = arith.constant 0 : index
    %3 = vector.load %arg2[%c0_1, %c0_2] : memref<32x5xf32, #tpu.memory_space<vmem>>, vector<32x5xf32>
    %cst = arith.constant dense<0.000000e+00> : vector<32x128xf32>
    %4 = tpu.matmul %3, %0, %cst {dimension_numbers = #tpu.dot_dimension_numbers<[1], [0], [0], [1], [0, 0, 1, 1], [], []>} : vector<32x5xf32>, vector<5x128xf32>, vector<32x128xf32> -> vector<32x128xf32>
    %c0_3 = arith.constant 0 : index
    %c0_4 = arith.constant 0 : index
    %5 = vector.load %arg3[%c0_3, %c0_4] : memref<32x3xf32, #tpu.memory_space<vmem>>, vector<32x1xf32>
    %6 = vector.broadcast %5 : vector<32x1xf32> to vector<32x128xf32>
    %7 = arith.addf %4, %6 : vector<32x128xf32>
    %8 = math.tanh %7 : vector<32x128xf32>
    %c0_5 = arith.constant 0 : index
    %c0_6 = arith.constant 0 : index
    %c0_7 = arith.constant 0 : index
    %9 = vector.load %arg4[%c0_5, %c0_6, %c0_7] : memref<2x32x32xf32, #tpu.memory_space<vmem>>, vector<1x32x32xf32>
    %10 = vector.shape_cast %9 : vector<1x32x32xf32> to vector<32x32xf32>
    %cst_8 = arith.constant dense<0.000000e+00> : vector<32x128xf32>
    %11 = tpu.matmul %10, %8, %cst_8 {dimension_numbers = #tpu.dot_dimension_numbers<[1], [0], [0], [1], [0, 0, 1, 1], [], []>} : vector<32x32xf32>, vector<32x128xf32>, vector<32x128xf32> -> vector<32x128xf32>
    %c0_9 = arith.constant 0 : index
    %c1 = arith.constant 1 : index
    %12 = vector.load %arg3[%c0_9, %c1] : memref<32x3xf32, #tpu.memory_space<vmem>>, vector<32x1xf32>
    %13 = vector.broadcast %12 : vector<32x1xf32> to vector<32x128xf32>
    %14 = arith.addf %11, %13 : vector<32x128xf32>
    %cst_10 = arith.constant 5.000000e-01 : f32
    %15 = vector.broadcast %cst_10 : f32 to vector<32x128xf32>
    %16 = arith.mulf %15, %14 : vector<32x128xf32>
    %17 = arith.addf %8, %16 : vector<32x128xf32>
    %18 = math.tanh %17 : vector<32x128xf32>
    %c1_11 = arith.constant 1 : index
    %c0_12 = arith.constant 0 : index
    %c0_13 = arith.constant 0 : index
    %19 = vector.load %arg4[%c1_11, %c0_12, %c0_13] : memref<2x32x32xf32, #tpu.memory_space<vmem>>, vector<1x32x32xf32>
    %20 = vector.shape_cast %19 : vector<1x32x32xf32> to vector<32x32xf32>
    %cst_14 = arith.constant dense<0.000000e+00> : vector<32x128xf32>
    %21 = tpu.matmul %20, %18, %cst_14 {dimension_numbers = #tpu.dot_dimension_numbers<[1], [0], [0], [1], [0, 0, 1, 1], [], []>} : vector<32x32xf32>, vector<32x128xf32>, vector<32x128xf32> -> vector<32x128xf32>
    %c0_15 = arith.constant 0 : index
    %c2 = arith.constant 2 : index
    %22 = vector.load %arg3[%c0_15, %c2] : memref<32x3xf32, #tpu.memory_space<vmem>>, vector<32x1xf32>
    %23 = vector.broadcast %22 : vector<32x1xf32> to vector<32x128xf32>
    %24 = arith.addf %21, %23 : vector<32x128xf32>
    %cst_16 = arith.constant 5.000000e-01 : f32
    %25 = vector.broadcast %cst_16 : f32 to vector<32x128xf32>
    %26 = arith.mulf %25, %24 : vector<32x128xf32>
    %27 = arith.addf %18, %26 : vector<32x128xf32>
    %28 = math.tanh %27 : vector<32x128xf32>
    %c0_17 = arith.constant 0 : index
    %c0_18 = arith.constant 0 : index
    %29 = vector.load %arg5[%c0_17, %c0_18] : memref<4x32xf32, #tpu.memory_space<vmem>>, vector<4x32xf32>
    %cst_19 = arith.constant dense<0.000000e+00> : vector<4x128xf32>
    %30 = tpu.matmul %29, %28, %cst_19 {dimension_numbers = #tpu.dot_dimension_numbers<[1], [0], [0], [1], [0, 0, 1, 1], [], []>} : vector<4x32xf32>, vector<32x128xf32>, vector<4x128xf32> -> vector<4x128xf32>
    %c0_20 = arith.constant 0 : index
    %c0_21 = arith.constant 0 : index
    %31 = vector.load %arg6[%c0_20, %c0_21] : memref<4x1xf32, #tpu.memory_space<vmem>>, vector<4x1xf32>
    %32 = vector.broadcast %31 : vector<4x1xf32> to vector<4x128xf32>
    %33 = arith.addf %30, %32 : vector<4x128xf32>
    %cst_22 = arith.constant 1.000000e+00 : f32
    %34 = vector.broadcast %cst_22 : f32 to vector<1x128xf32>
    %35 = arith.mulf %1, %34 : vector<1x128xf32>
    %36 = arith.subf %33, %2 : vector<4x128xf32>
    %37 = vector.broadcast %35 : vector<1x128xf32> to vector<4x128xf32>
    %38 = arith.mulf %37, %36 : vector<4x128xf32>
    %39 = arith.addf %2, %38 : vector<4x128xf32>
    %c0_23 = arith.constant 0 : index
    %c0_24 = arith.constant 0 : index
    %40 = vector.load %arg7[%c0_23, %c0_24] : memref<4x128xf32, #tpu.memory_space<vmem>>, vector<4x128xf32>
    tpu.vector_store %arg7[%c0_23, %c0_24], %39 {strides = array<i32>} : memref<4x128xf32, #tpu.memory_space<vmem>>, vector<4x128xf32>,
    return
  }
  func.func @transform_0(%arg0: i32) -> (i32, i32) {
    %c0_i32 = arith.constant 0 : i32
    %c0_i32_0 = arith.constant 0 : i32
    return %c0_i32, %arg0 : i32, i32
  }
  func.func @transform_1(%arg0: i32) -> (i32, i32) {
    %c0_i32 = arith.constant 0 : i32
    %c0_i32_0 = arith.constant 0 : i32
    %c0_i32_1 = arith.constant 0 : i32
    return %c0_i32, %c0_i32_0 : i32, i32
  }
  func.func @transform_2(%arg0: i32) -> (i32, i32) {
    %c0_i32 = arith.constant 0 : i32
    %c0_i32_0 = arith.constant 0 : i32
    %c0_i32_1 = arith.constant 0 : i32
    return %c0_i32, %c0_i32_0 : i32, i32
  }
  func.func @transform_3(%arg0: i32) -> (i32, i32, i32) {
    %c0_i32 = arith.constant 0 : i32
    %c0_i32_0 = arith.constant 0 : i32
    %c0_i32_1 = arith.constant 0 : i32
    %c0_i32_2 = arith.constant 0 : i32
    return %c0_i32, %c0_i32_0, %c0_i32_1 : i32, i32, i32
  }
  func.func @transform_4(%arg0: i32) -> (i32, i32) {
    %c0_i32 = arith.constant 0 : i32
    %c0_i32_0 = arith.constant 0 : i32
    %c0_i32_1 = arith.constant 0 : i32
    return %c0_i32, %c0_i32_0 : i32, i32
  }
  func.func @transform_5(%arg0: i32) -> (i32, i32) {
    %c0_i32 = arith.constant 0 : i32
    %c0_i32_0 = arith.constant 0 : i32
    %c0_i32_1 = arith.constant 0 : i32
    return %c0_i32, %c0_i32_0 : i32, i32
  }
  func.func @transform_6(%arg0: i32) -> (i32, i32) {
    %c0_i32 = arith.constant 0 : i32
    %c0_i32_0 = arith.constant 0 : i32
    return %c0_i32, %arg0 : i32, i32
  }
}

</mosaic_0001>

<bundles_post_ra>
// kernel: gnet_forward.1
= control target key start
LH: loop header
LB: loop body
LE: loop exit
PB: predicated region body
PF: predicated region fallthrough
CT: control target
= control target key end

     0   :  { %vm65_vm0 = vcmask 1044480   ;;  %vm52_vm1 = vcmask 39936   ;;  %v642_v3 = vmov 0   ;;  %vm178_vm2 = vcmask 261120   ;;  %s765_s0 = inlined_call_operand.vmem [shape: f32[5,128], index: 0, kind: input, shape index: {}]   ;;  %s766_s1 = inlined_call_operand.vmem [shape: f32[32,5], index: 1, kind: input, shape index: {}]   ;;  %s767_s2 = inlined_call_operand.vmem [shape: f32[32,3], index: 2, kind: input, shape index: {}]   ;;  %s768_s3 = inlined_call_operand.vmem [shape: f32[2,32,32], index: 3, kind: input, shape index: {}]   ;;  %s769_s5 = inlined_call_operand.vmem [shape: f32[4,1], index: 5, kind: input, shape index: {}]   ;;  %s770_s4 = inlined_call_operand.vmem [shape: f32[4,32], index: 4, kind: input, shape index: {}]   ;;  %s771_s6 = inlined_call_operand.vmem [shape: f32[4,128], index: 6, kind: output, shape index: {}]  }
   0x1   :  { %v685_v0 = vld [vmem:[%s765_s0] sm:$0x1f]  ;;  %v25_v2 = vld [vmem:[%s766_s1 + $0x8] sm:$0xff]  ;;  %612 = vset.pattern.permute.xlu1 %v642_v3  ;;  %611 = vset.pattern.permute.xlu0 %v642_v3  ;;  %v26_v4 = vld [vmem:[%s766_s1 + $0x10] sm:$0xff]  ;;  %v643_v11 = vmov 1   ;;  %v644_v32 = vmov 2  }
   0x2   :  { %v24_v1 = vld [vmem:[%s766_s1] sm:$0xff]  ;;  %559 = vmatprep.subr.msk.mxu0 %vm65_vm0, %v685_v0  ;;  %v31_v5 = vld [vmem:[%s767_s2 + $0x18] sm:$0xff]  ;;  %v29_v6 = vld [vmem:[%s767_s2 + $0x8] sm:$0xff]  ;;  %v645_v60 = vmov 0.0   ;;  %vm646_vm3 = vmmov 0  }
   0x3   :  { %561 = vmatprep.mubr.msk.f32.mxu0 %vm52_vm1, %v24_v1  ;;  %560 = vmatpush3.msk.msra.mxu0 %vm65_vm0, %v685_v0  ;;  %v30_v7 = vld [vmem:[%s767_s2 + $0x10] sm:$0xff]  ;;  %v27_v8 = vld [vmem:[%s766_s1 + $0x18] sm:$0xff]  ;;  %v28_v9 = vld [vmem:[%s767_s2] sm:$0xff] }
   0x4   :  { %49 = vperm.xlu0 %611, %v31_v5   ;;  %562 = vmatmul.mubr.msk.f32.vlgmr.msra.gmra.mxu0 %vm52_vm1, %v25_v2  ;;  %v158_v10 = vld [vmem:[%s768_s3] sm:$0xff]  ;;  %v159_v28 = vld [vmem:[%s768_s3 + $0x8] sm:$0xff]  ;;  %v160_v29 = vld [vmem:[%s768_s3 + $0x10] sm:$0xff] }
   0x5   :  { %39 = vperm.xlu1 %612, %v29_v6   ;;  %564 = vmatprep.mubr.msk.f32.mxu0 %vm52_vm1, %v26_v4  ;;  %v161_v30 = vld [vmem:[%s768_s3 + $0x18] sm:$0xff]  ;;  %v524_v31 = vld [vmem:[%s768_s3 + $0x20] sm:$0xff]  ;;  %v525_v57 = vld [vmem:[%s768_s3 + $0x28] sm:$0xff] }
   0x6   :  { %575 = vmatprep.mubr.msk.f32.mxu1 %vm178_vm2, %v158_v10  ;;  %v526_v58 = vld [vmem:[%s768_s3 + $0x30] sm:$0xff]  ;;  %v527_v59 = vld [vmem:[%s768_s3 + $0x38] sm:$0xff]  ;;  %v419_v61 = vld [vmem:[%s769_s5] sm:$0xf] }
   0x8   :  { %44 = vperm.xlu0 %611, %v30_v7   ;;  %565 = vmatmul.mubr.msk.f32.gmra.mxu0 %vm52_vm1, %v27_v8 }
   0x9   :  { %34 = vperm.xlu1 %612, %v28_v9   ;;  %589 = vmatprep.mubr.msk.f32.mxu0 %vm178_vm2, %v524_v31 }
   0xc   :  { %613 = vset.pattern.permute.xlu0 %v643_v11 }
   0xd   :  { %614 = vset.pattern.permute.xlu1 %v643_v11  ;;  %175 = vperm.xlu0 %613, %v31_v5  }
   0xe   :  { %171 = vperm.xlu1 %614, %v30_v7  }
  0x11   :  { %163 = vperm.xlu0 %613, %v28_v9  }
  0x12   :  { %167 = vperm.xlu1 %614, %v29_v6  }
  0x15   :  { %616 = vset.pattern.permute.xlu0 %v644_v32 }
  0x16   :  { %615 = vset.pattern.permute.xlu1 %v644_v32  ;;  %302 = vperm.xlu0 %616, %v30_v7  }
  0x17   :  { %306 = vperm.xlu1 %615, %v31_v5  }
  0x1a   :  { %617 = vset.pattern.permute.xlu0 %v642_v3 }
  0x1b   :  { %298 = vperm.xlu1 %615, %v29_v6   ;;  %422 = vperm.xlu0 %617, %v419_v61  }
  0x1f   :  { %294 = vperm.xlu1 %615, %v28_v9  }
  0x7f   :  { %v50_v12 = vpop.permute.xlu0 %49 }
  0x80   :  { %v40_v13 = vpop.permute.xlu1 %39 }
  0x83   :  { %v45_v17 = vpop.permute.xlu0 %44 }
  0x84   :  { %v35_v19 = vpop.permute.xlu1 %34 }
  0x88   :  { %v176_v34 = vpop.permute.xlu0 %175 }
  0x89   :  { %v172_v33 = vpop.permute.xlu1 %171 }
  0x8c   :  { %v164_v37 = vpop.permute.xlu0 %163 }
  0x8d   :  { %v168_v35 = vpop.permute.xlu1 %167 }
  0x91   :  { %v303_v6 = vpop.permute.xlu0 %302 }
  0x92   :  { %v307_v62 = vpop.permute.xlu1 %306 }
  0x96   :  { %v299_v63 = vpop.permute.xlu1 %298 }
  0x9a   :  { %v295_v2 = vpop.permute.xlu1 %294 }
  0xc4   :  { %v563_v14 = vpop.f32.mrf.mxu0 }
  0xc5   :  { %v141_v21 = vadd.f32 %v563_v14, %v40_v13 }
  0xc6   :  { %v135_v15 = vpop.f32.mrf.mxu0 }
  0xc7   :  { %v136_v23 = vadd.f32 %v135_v15, %v35_v19 }
  0xc8   :  { %v566_v16 = vpop.f32.mrf.mxu0 }
  0xc9   :  { %v151_v18 = vadd.f32 %v566_v16, %v50_v12 }
  0xca   :  { %v145_v20 = vpop.f32.mrf.mxu0 }
  0xcb   :  { %618 = vtanh.f32 %v151_v18  ;;  %v146_v22 = vadd.f32 %v145_v20, %v45_v17 }
  0xcd   :  { %620 = vtanh.f32 %v146_v22  ;;  %v418_v22 = vld [vmem:[%s770_s4] sm:$0xf] }
  0xce   :  { %622 = vtanh.f32 %v141_v21 }
  0xcf   :  { %624 = vtanh.f32 %v136_v23 }
  0xd8   :  { %v619_v24 = vpop.eup %618 }
  0xd9   :  { %567 = vmatprep.subr.mxu1 %v619_v24 }
  0xda   :  { %v621_v25 = vpop.eup %620  ;;  %568 = vmatpush3.msra.mxu1 %v619_v24 }
  0xdb   :  { %569 = vmatprep.subr.mxu1 %v621_v25  ;;  %v623_v26 = vpop.eup %622 }
  0xdc   :  { %570 = vmatpush3.msra.mxu1 %v621_v25  ;;  %v625_v27 = vpop.eup %624 }
  0xdd   :  { %571 = vmatprep.subr.mxu1 %v623_v26 }
  0xde   :  { %572 = vmatpush3.msra.mxu1 %v623_v26 }
  0xdf   :  { %573 = vmatprep.subr.mxu1 %v625_v27 }
  0xe0   :  { %574 = vmatpush3.msra.mxu1 %v625_v27 }
  0xe1   :  { %576 = vmatmul.mubr.msk.f32.vlgmr.msra.gmra.mxu1 %vm178_vm2, %v159_v28  ;;  %595 = vmatprep.subr.mxu1 %v645_v60  ;;  %v498_v28 = vrot.slane %v685_v0, 1 }
  0xe2   :  { %578 = vmatprep.mubr.msk.f32.mxu1 %vm178_vm2, %v160_v29 }
  0xe5   :  { %579 = vmatmul.mubr.msk.f32.gmra.mxu1 %vm178_vm2, %v161_v30 }
  0xe6   :  { %603 = vmatprep.mubr.msk.f32.mxu1 %vm646_vm3, %v645_v60 }
 0x1a1   :  { %v577_v36 = vpop.f32.mrf.mxu1 }
 0x1a2   :  { %v263_v39 = vadd.f32 %v577_v36, %v168_v35 }
 0x1a3   :  { %v257_v38 = vpop.f32.mrf.mxu1 }
 0x1a4   :  { %v258_v41 = vadd.f32 %v257_v38, %v164_v37  ;;  %v277_v44 = vmul.f32 0.5, %v263_v39 }
 0x1a5   :  { %v580_v40 = vpop.f32.mrf.mxu1 }
 0x1a6   :  { %v273_v42 = vadd.f32 %v580_v40, %v176_v34  ;;  %v276_v47 = vmul.f32 0.5, %v258_v41  ;;  %v281_v50 = vadd.f32 %v623_v26, %v277_v44 }
 0x1a7   :  { %v267_v43 = vpop.f32.mrf.mxu1 }
 0x1a8   :  { %v279_v45 = vmul.f32 0.5, %v273_v42  ;;  %v268_v46 = vadd.f32 %v267_v43, %v172_v33  ;;  %v280_v52 = vadd.f32 %v625_v27, %v276_v47  ;;  %v423_v27 = vpop.permute.xlu0 %422 }
 0x1aa   :  { %v283_v48 = vadd.f32 %v619_v24, %v279_v45  ;;  %v278_v49 = vmul.f32 0.5, %v268_v46  ;;  %v501_v24 = vlaneseq }
 0x1ac   :  { %626 = vtanh.f32 %v283_v48  ;;  %v282_v51 = vadd.f32 %v621_v25, %v278_v49  ;;  %v502_v25 = vshrl.u32 %v501_v24, 7 }
 0x1ae   :  { %628 = vtanh.f32 %v282_v51  ;;  %v503_v26 = vsub.s32 0, %v502_v25 }
 0x1af   :  { %630 = vtanh.f32 %v281_v50 }
 0x1b0   :  { %632 = vtanh.f32 %v280_v52  ;;  %v504_v31 = vrot.slane %v685_v0, %v503_v26 }
 0x1b9   :  { %v627_v53 = vpop.eup %626 }
 0x1ba   :  { %581 = vmatprep.subr.mxu0 %v627_v53 }
 0x1bb   :  { %v629_v54 = vpop.eup %628  ;;  %582 = vmatpush3.msra.mxu0 %v627_v53 }
 0x1bc   :  { %583 = vmatprep.subr.mxu0 %v629_v54  ;;  %v631_v55 = vpop.eup %630 }
 0x1bd   :  { %584 = vmatpush3.msra.mxu0 %v629_v54  ;;  %v633_v56 = vpop.eup %632 }
 0x1be   :  { %585 = vmatprep.subr.mxu0 %v631_v55 }
 0x1bf   :  { %586 = vmatpush3.msra.mxu0 %v631_v55 }
 0x1c0   :  { %587 = vmatprep.subr.mxu0 %v633_v56 }
 0x1c1   :  { %588 = vmatpush3.msra.mxu0 %v633_v56 }
 0x1c2   :  { %590 = vmatmul.mubr.msk.f32.vlgmr.msra.gmra.mxu0 %vm178_vm2, %v525_v57 }
 0x1c3   :  { %592 = vmatprep.mubr.msk.f32.mxu0 %vm178_vm2, %v526_v58 }
 0x1c6   :  { %593 = vmatmul.mubr.msk.f32.gmra.mxu0 %vm178_vm2, %v527_v59 }
 0x282   :  { %v591_v1 = vpop.f32.mrf.mxu0 }
 0x283   :  { %v393_v4 = vadd.f32 %v591_v1, %v299_v63 }
 0x284   :  { %v387_v3 = vpop.f32.mrf.mxu0 }
 0x285   :  { %v388_v7 = vadd.f32 %v387_v3, %v295_v2  ;;  %v407_v10 = vmul.f32 0.5, %v393_v4 }
 0x286   :  { %v594_v5 = vpop.f32.mrf.mxu0 }
 0x287   :  { %v403_v8 = vadd.f32 %v594_v5, %v307_v62  ;;  %v406_v13 = vmul.f32 0.5, %v388_v7  ;;  %v411_v16 = vadd.f32 %v631_v55, %v407_v10 }
 0x288   :  { %v397_v9 = vpop.f32.mrf.mxu0 }
 0x289   :  { %v409_v11 = vmul.f32 0.5, %v403_v8  ;;  %v398_v12 = vadd.f32 %v397_v9, %v303_v6  ;;  %v410_v18 = vadd.f32 %v633_v56, %v406_v13 }
 0x28b   :  { %v413_v14 = vadd.f32 %v627_v53, %v409_v11  ;;  %v408_v15 = vmul.f32 0.5, %v398_v12 }
 0x28d   :  { %634 = vtanh.f32 %v413_v14  ;;  %v412_v17 = vadd.f32 %v629_v54, %v408_v15 }
 0x28f   :  { %636 = vtanh.f32 %v412_v17 }
 0x290   :  { %638 = vtanh.f32 %v411_v16 }
 0x291   :  { %640 = vtanh.f32 %v410_v18 }
 0x29a   :  { %v635_v19 = vpop.eup %634 }
 0x29b   :  { %596 = vmatpush3.msra.mxu1 %v635_v19 }
 0x29c   :  { %v637_v20 = vpop.eup %636  ;;  %597 = vmatprep.subr.mxu1 %v645_v60 }
 0x29d   :  { %598 = vmatpush3.msra.mxu1 %v637_v20  ;;  %v639_v21 = vpop.eup %638 }
 0x29e   :  { %599 = vmatprep.subr.mxu1 %v645_v60  ;;  %v641_v23 = vpop.eup %640 }
 0x29f   :  { %600 = vmatpush3.msra.mxu1 %v639_v21 }
 0x2a0   :  { %601 = vmatprep.subr.mxu1 %v645_v60 }
 0x2a1   :  { %602 = vmatpush3.msra.mxu1 %v641_v23 }
 0x2a2   :  { %604 = vmatmul.mubr.msk.f32.vlgmr.msra.gmra.mxu1 %vm178_vm2, %v418_v22 }
 0x362   :  { %v494_v29 = vpop.f32.mrf.mxu1 }
 0x363   :  { %v495_v30 = vadd.f32 %v494_v29, %v423_v27 }
 0x364   :  { %v605_v32 = vpop.f32.mrf.mxu1 }
 0x365   :  { %v500_v33 = vsub.f32 %v495_v30, %v498_v28 }
 0x367   :  { %v505_v34 = vmul.f32 %v504_v31, %v500_v33 }
 0x369   :  { %v507_v35 = vrot.slane %v505_v34, 7 }
 0x36b   :  { %v509_v36 = vadd.f32 %v507_v35, %v685_v0 }
 0x36d   :  { %510 = vst [vmem:[%s771_s6 - $0x1] sm:$0x1e] %v509_v36 }

</bundles_post_ra>
